<compile_context>
chip_gen: v7x
topology: tpu7x:2x2x1
jax: 0.10.0
libtpu: 0.0.40
codegen_flags: <defaults>
</compile_context>

<pallas_src>
import functools

import jax
import jax.numpy as jnp
from jax.experimental import pallas as pl
from jax.experimental.pallas import tpu as pltpu

_LANES = 128
_DEFAULT_BLOCK_BYTES = 4 * 1024 * 1024   # ~4 MiB: amortizes step overhead,
                                         # double-buffered fits v5e scoped VMEM.


# ----------------------------------------------------------------------------
# Pallas kernel: streaming sum(|x|^p) of one (rows, 128) weight view.
# Grid = (n_split, blocks_per_split); axis 0 is "parallel" (v7x dual-TC),
# axis 1 is the "arbitrary" reduction axis with a resident accumulator block.
# ----------------------------------------------------------------------------
def _sum_abs_pow_kernel(x_ref, o_ref, *, p, acc_rows):
    j = pl.program_id(1)

    @pl.when(j == 0)
    def _():
        o_ref[...] = jnp.zeros_like(o_ref)

    x = x_ref[...].astype(jnp.float32)       # upcast after the VMEM load
    if p == 2:
        v = x * x
    elif p == 1:
        v = jnp.abs(x)
    else:
        v = jnp.abs(x) ** p                  # TODO(synk): EUP-bound for general p

    t, lanes = v.shape
    # (T,128) -> (T//acc_rows, acc_rows, 128) regroups whole vregs; the axis-0
    # reduce is acc_rows/8 independent elementwise add chains (VPU), keeping
    # the accumulator lane-dense.  Final collapse to a scalar is in the glue.
    o_ref[0] = o_ref[0] + jnp.sum(v.reshape(t // acc_rows, acc_rows, lanes),
                                  axis=0)


def _pallas_sum_abs_pow(x2d, p, tile_rows, n_split, blk_per_split, gran):
    """sum(|x2d[:covered_rows]|^p) via one pallas_call; returns f32 scalar."""
    acc_rows = 64 if tile_rows % 64 == 0 else gran
    partial = pl.pallas_call(
        functools.partial(_sum_abs_pow_kernel, p=p, acc_rows=acc_rows),
        out_shape=jax.ShapeDtypeStruct((n_split, acc_rows, _LANES),
                                       jnp.float32),
        grid_spec=pltpu.PrefetchScalarGridSpec(
            num_scalar_prefetch=0,
            grid=(n_split, blk_per_split),
            in_specs=[
                pl.BlockSpec((tile_rows, _LANES),
                             lambda c, j: (c * blk_per_split + j, 0)),
            ],
            out_specs=pl.BlockSpec((1, acc_rows, _LANES),
                                   lambda c, j: (c, 0, 0)),
        ),
        compiler_params=pltpu.CompilerParams(
            dimension_semantics=("parallel", "arbitrary")),
    )(x2d)
    return jnp.sum(partial)


# ----------------------------------------------------------------------------
# Glue helpers (fused XLA slice+reduce for small tensors / tails).
# ----------------------------------------------------------------------------
def _glue_sum_abs_pow(x, p):
    xf = x.astype(jnp.float32)
    if p == 2:
        return jnp.sum(xf * xf)
    if p == 1:
        return jnp.sum(jnp.abs(xf))
    return jnp.sum(jnp.abs(xf) ** p)


def _sum_abs_pow(w, p, max_block_bytes):
    """sum(|w|^p) in f32; Pallas streams the aligned bulk, glue does the rest."""
    n = int(w.size)
    if n == 0:
        return jnp.float32(0.0)
    if not jnp.issubdtype(w.dtype, jnp.floating):
        return _glue_sum_abs_pow(w, p)

    itemsize = jnp.dtype(w.dtype).itemsize
    gran = max(8, 32 // max(itemsize, 1))        # 8 rows f32, 16 bf16, 32 fp8
    flat = w.reshape(-1)                         # free: contiguous, row-major

    if n % _LANES != 0:
        # Non-lane-aligned: routing through Pallas would require a pad copy
        # (extra read+write of the whole tensor); the fused XLA reduce is
        # already at the HBM roofline for these.
        return _glue_sum_abs_pow(flat, p)

    rows = n // _LANES
    if rows < gran:
        return _glue_sum_abs_pow(flat, p)        # tiny tensor: skip the kernel

    x2d = flat.reshape(rows, _LANES)             # free layout-compatible view

    max_rows = max(gran, max_block_bytes // (_LANES * itemsize))
    tile_rows = min(rows, max_rows)
    if tile_rows >= 64:
        tile_rows = (tile_rows // 64) * 64
    else:
        tile_rows = (tile_rows // gran) * gran

    n_blk = rows // tile_rows
    n_split = 2 if n_blk >= 2 else 1             # v7x: shard across both TCs
    blk_per_split = n_blk // n_split
    covered_rows = n_split * blk_per_split * tile_rows

    total = _pallas_sum_abs_pow(x2d, p, tile_rows, n_split, blk_per_split,
                                gran)
    if covered_rows < rows:
        # Block remainder: fused slice+reduce reads only the leftover bytes.
        total = total + _glue_sum_abs_pow(flat[covered_rows * _LANES:], p)
    return total


# ----------------------------------------------------------------------------
# Regularization module equivalent
# ----------------------------------------------------------------------------
def get_weight(named_params):
    """Mimics Regularization.get_weight: keep params whose name has 'weight'."""
    return [(name, param) for name, param in named_params if "weight" in name]


@functools.partial(jax.jit, static_argnums=(2, 3))
def _loss_impl(weights, weight_decay, p, max_block_bytes):
    norms = []
    for w in weights:
        total = _sum_abs_pow(w, p, max_block_bytes)
        if p == 2:
            norms.append(jnp.sqrt(total))
        elif p == 1:
            norms.append(total)
        else:
            norms.append(total ** (1.0 / p))
    reg = jnp.sum(jnp.stack(norms))
    return 0.5 * weight_decay.astype(jnp.float32) * reg


def regularization_loss(weight_list, weight_decay, p=2,
                        max_block_bytes=_DEFAULT_BLOCK_BYTES):
    """Mimics Regularization.regularization_loss (per-tensor norms, weighted)."""
    if not weight_list:
        return jnp.float32(0.0)
    weights = tuple(w for _name, w in weight_list)
    return _loss_impl(weights, jnp.asarray(weight_decay, jnp.float32),
                      p, int(max_block_bytes))


def regularization_forward(named_params, weight_decay, p=2,
                           max_block_bytes=_DEFAULT_BLOCK_BYTES):
    """Equivalent of Regularization.forward()."""
    if isinstance(weight_decay, (int, float)):
        assert weight_decay > 0, "param weight_decay can not <=0"
    weight_list = get_weight(named_params)
    return regularization_loss(weight_list, weight_decay, p=p,
                               max_block_bytes=max_block_bytes)


# ----------------------------------------------------------------------------
# Main: small synthetic "model" parameter list exercising every code path.
# ----------------------------------------------------------------------------
if __name__ == "__main__":
    key = jax.random.PRNGKey(0)
    ks = jax.random.split(key, 6)

    # Deterministic synthetic model parameters (tiny shapes):
    #   conv1.weight (4,4,3,3)  -> 144 elems, not 128-aligned -> glue path
    #   bn1.weight   (4,)       -> tiny                        -> glue path
    #   fc1.weight   (32,32)    -> 1024 elems, 1 block         -> Pallas
    #   fc2.weight   (256,128)  -> 32768 elems, multi-block    -> Pallas, 2-way split
    #   emb.weight   (64,128)   -> bf16 on the wire            -> Pallas
    #   *.bias                  -> excluded (name lacks 'weight')
    named_params = [
        ("conv1.weight", jax.random.normal(ks[0], (4, 4, 3, 3), jnp.float32)),
        ("conv1.bias", jax.random.normal(ks[1], (4,), jnp.float32)),
        ("bn1.weight", jax.random.normal(ks[2], (4,), jnp.float32)),
        ("fc1.weight", jax.random.normal(ks[3], (32, 32), jnp.float32)),
        ("fc2.weight", jax.random.normal(ks[4], (256, 128), jnp.float32)),
        ("emb.weight",
         jax.random.normal(ks[5], (64, 128), jnp.float32).astype(jnp.bfloat16)),
        ("fc2.bias", jnp.zeros((128,), jnp.float32)),
    ]

    weight_decay = 100.0
    p = 2

    # Small max_block_bytes so the multi-block / dual-split Pallas path is
    # exercised even at these demo shapes (default is 4 MiB for real models).
    loss = regularization_forward(named_params, weight_decay, p=p,
                                  max_block_bytes=64 * 1024)
    loss = jax.block_until_ready(loss)

    # Pure-JAX reference check (torch.norm semantics, f32 accumulation).
    ref = jnp.float32(0.0)
    for name, w in named_params:
        if "weight" in name:
            wf = w.astype(jnp.float32)
            ref = ref + jnp.sqrt(jnp.sum(wf * wf))
    ref = 0.5 * weight_decay * ref

    assert jnp.allclose(loss, ref, rtol=1e-4, atol=1e-3), (loss, ref)
    print("KERNEL_OK")
</pallas_src>

<mosaic_0001>
module attributes {stable_mosaic.version = 11 : i64} {
  func.func @_sum_abs_pow_kernel(%arg0: i32, %arg1: i32, %arg2: memref<8x128xf32, #tpu.memory_space<vmem>>, %arg3: memref<1x8x128xf32, #tpu.memory_space<vmem>>) attributes {dimension_semantics = [#tpu.dimension_semantics<parallel>, #tpu.dimension_semantics<arbitrary>], iteration_bounds = array<i64: 1, 1>, scalar_prefetch = 0 : i64, scratch_operands = 0 : i64, tpu.core_type = #tpu.core_type<tc>, window_params = [{transform_indices = @transform_0, window_bounds = array<i64: 8, 128>}, {transform_indices = @transform_1, window_bounds = array<i64: 1, 8, 128>}]} {
    %c0_i32 = arith.constant 0 : i32
    %0 = arith.cmpi eq, %arg1, %c0_i32 : i32
    %1 = arith.extui %0 : i1 to i32
    %c0_i32_0 = arith.constant 0 : i32
    %2 = arith.cmpi ne, %1, %c0_i32_0 : i32
    scf.if %2 {
      %cst_8 = arith.constant 0.000000e+00 : f32
      %13 = vector.broadcast %cst_8 : f32 to vector<1x8x128xf32>
      %c0_9 = arith.constant 0 : index
      %c0_10 = arith.constant 0 : index
      %c0_11 = arith.constant 0 : index
      %14 = vector.load %arg3[%c0_9, %c0_10, %c0_11] : memref<1x8x128xf32, #tpu.memory_space<vmem>>, vector<1x8x128xf32>
      tpu.vector_store %arg3[%c0_9, %c0_10, %c0_11], %13 {strides = array<i32>} : memref<1x8x128xf32, #tpu.memory_space<vmem>>, vector<1x8x128xf32>,
    } else {
    }
    %c0 = arith.constant 0 : index
    %c0_1 = arith.constant 0 : index
    %3 = vector.load %arg2[%c0, %c0_1] : memref<8x128xf32, #tpu.memory_space<vmem>>, vector<8x128xf32>
    %4 = arith.mulf %3, %3 : vector<8x128xf32>
    %c0_2 = arith.constant 0 : index
    %c0_3 = arith.constant 0 : index
    %c0_4 = arith.constant 0 : index
    %5 = vector.load %arg3[%c0_2, %c0_3, %c0_4] : memref<1x8x128xf32, #tpu.memory_space<vmem>>, vector<1x8x128xf32>
    %6 = vector.shape_cast %5 : vector<1x8x128xf32> to vector<8x128xf32>
    %7 = vector.shape_cast %4 : vector<8x128xf32> to vector<1x8x128xf32>
    %cst = arith.constant dense<0.000000e+00> : vector<8x128xf32>
    %8 = vector.multi_reduction <add>, %7, %cst [0] : vector<1x8x128xf32> to vector<8x128xf32>
    %9 = arith.addf %6, %8 : vector<8x128xf32>
    %c0_5 = arith.constant 0 : index
    %c0_6 = arith.constant 0 : index
    %c0_7 = arith.constant 0 : index
    %10 = vector.load %arg3[%c0_5, %c0_6, %c0_7] : memref<1x8x128xf32, #tpu.memory_space<vmem>>, vector<1x8x128xf32>
    %11 = vector.shape_cast %10 : vector<1x8x128xf32> to vector<8x128xf32>
    %12 = vector.shape_cast %9 : vector<8x128xf32> to vector<1x8x128xf32>
    tpu.vector_store %arg3[%c0_5, %c0_6, %c0_7], %12 {strides = array<i32>} : memref<1x8x128xf32, #tpu.memory_space<vmem>>, vector<1x8x128xf32>,
    return
  }
  func.func @transform_0(%arg0: i32, %arg1: i32) -> (i32, i32) {
    %c1_i32 = arith.constant 1 : i32
    %0 = arith.muli %arg0, %c1_i32 : i32
    %1 = arith.addi %0, %arg1 : i32
    %c0_i32 = arith.constant 0 : i32
    %c0_i32_0 = arith.constant 0 : i32
    return %1, %c0_i32 : i32, i32
  }
  func.func @transform_1(%arg0: i32, %arg1: i32) -> (i32, i32, i32) {
    %c0_i32 = arith.constant 0 : i32
    %c0_i32_0 = arith.constant 0 : i32
    %c0_i32_1 = arith.constant 0 : i32
    return %arg0, %c0_i32, %c0_i32_0 : i32, i32, i32
  }
}

module attributes {stable_mosaic.version = 11 : i64} {
  func.func @_sum_abs_pow_kernel(%arg0: i32, %arg1: i32, %arg2: memref<128x128xf32, #tpu.memory_space<vmem>>, %arg3: memref<1x64x128xf32, #tpu.memory_space<vmem>>) attributes {dimension_semantics = [#tpu.dimension_semantics<parallel>, #tpu.dimension_semantics<arbitrary>], iteration_bounds = array<i64: 2, 1>, scalar_prefetch = 0 : i64, scratch_operands = 0 : i64, tpu.core_type = #tpu.core_type<tc>, window_params = [{transform_indices = @transform_0, window_bounds = array<i64: 128, 128>}, {transform_indices = @transform_1, window_bounds = array<i64: 1, 64, 128>}]} {
    %c0_i32 = arith.constant 0 : i32
    %0 = arith.cmpi eq, %arg1, %c0_i32 : i32
    %1 = arith.extui %0 : i1 to i32
    %c0_i32_0 = arith.constant 0 : i32
    %2 = arith.cmpi ne, %1, %c0_i32_0 : i32
    scf.if %2 {
      %cst_8 = arith.constant 0.000000e+00 : f32
      %13 = vector.broadcast %cst_8 : f32 to vector<1x64x128xf32>
      %c0_9 = arith.constant 0 : index
      %c0_10 = arith.constant 0 : index
      %c0_11 = arith.constant 0 : index
      %14 = vector.load %arg3[%c0_9, %c0_10, %c0_11] : memref<1x64x128xf32, #tpu.memory_space<vmem>>, vector<1x64x128xf32>
      tpu.vector_store %arg3[%c0_9, %c0_10, %c0_11], %13 {strides = array<i32>} : memref<1x64x128xf32, #tpu.memory_space<vmem>>, vector<1x64x128xf32>,
    } else {
    }
    %c0 = arith.constant 0 : index
    %c0_1 = arith.constant 0 : index
    %3 = vector.load %arg2[%c0, %c0_1] : memref<128x128xf32, #tpu.memory_space<vmem>>, vector<128x128xf32>
    %4 = arith.mulf %3, %3 : vector<128x128xf32>
    %c0_2 = arith.constant 0 : index
    %c0_3 = arith.constant 0 : index
    %c0_4 = arith.constant 0 : index
    %5 = vector.load %arg3[%c0_2, %c0_3, %c0_4] : memref<1x64x128xf32, #tpu.memory_space<vmem>>, vector<1x64x128xf32>
    %6 = vector.shape_cast %5 : vector<1x64x128xf32> to vector<64x128xf32>
    %7 = vector.shape_cast %4 : vector<128x128xf32> to vector<2x64x128xf32>
    %cst = arith.constant dense<0.000000e+00> : vector<64x128xf32>
    %8 = vector.multi_reduction <add>, %7, %cst [0] : vector<2x64x128xf32> to vector<64x128xf32>
    %9 = arith.addf %6, %8 : vector<64x128xf32>
    %c0_5 = arith.constant 0 : index
    %c0_6 = arith.constant 0 : index
    %c0_7 = arith.constant 0 : index
    %10 = vector.load %arg3[%c0_5, %c0_6, %c0_7] : memref<1x64x128xf32, #tpu.memory_space<vmem>>, vector<1x64x128xf32>
    %11 = vector.shape_cast %10 : vector<1x64x128xf32> to vector<64x128xf32>
    %12 = vector.shape_cast %9 : vector<64x128xf32> to vector<1x64x128xf32>
    tpu.vector_store %arg3[%c0_5, %c0_6, %c0_7], %12 {strides = array<i32>} : memref<1x64x128xf32, #tpu.memory_space<vmem>>, vector<1x64x128xf32>,
    return
  }
  func.func @transform_0(%arg0: i32, %arg1: i32) -> (i32, i32) {
    %c1_i32 = arith.constant 1 : i32
    %0 = arith.muli %arg0, %c1_i32 : i32
    %1 = arith.addi %0, %arg1 : i32
    %c0_i32 = arith.constant 0 : i32
    %c0_i32_0 = arith.constant 0 : i32
    return %1, %c0_i32 : i32, i32
  }
  func.func @transform_1(%arg0: i32, %arg1: i32) -> (i32, i32, i32) {
    %c0_i32 = arith.constant 0 : i32
    %c0_i32_0 = arith.constant 0 : i32
    %c0_i32_1 = arith.constant 0 : i32
    return %arg0, %c0_i32, %c0_i32_0 : i32, i32, i32
  }
}

module attributes {stable_mosaic.version = 11 : i64} {
  func.func @_sum_abs_pow_kernel(%arg0: i32, %arg1: i32, %arg2: memref<64x128xbf16, #tpu.memory_space<vmem>>, %arg3: memref<1x64x128xf32, #tpu.memory_space<vmem>>) attributes {dimension_semantics = [#tpu.dimension_semantics<parallel>, #tpu.dimension_semantics<arbitrary>], iteration_bounds = array<i64: 1, 1>, scalar_prefetch = 0 : i64, scratch_operands = 0 : i64, tpu.core_type = #tpu.core_type<tc>, window_params = [{transform_indices = @transform_0, window_bounds = array<i64: 64, 128>}, {transform_indices = @transform_1, window_bounds = array<i64: 1, 64, 128>}]} {
    %c0_i32 = arith.constant 0 : i32
    %0 = arith.cmpi eq, %arg1, %c0_i32 : i32
    %1 = arith.extui %0 : i1 to i32
    %c0_i32_0 = arith.constant 0 : i32
    %2 = arith.cmpi ne, %1, %c0_i32_0 : i32
    scf.if %2 {
      %cst_8 = arith.constant 0.000000e+00 : f32
      %14 = vector.broadcast %cst_8 : f32 to vector<1x64x128xf32>
      %c0_9 = arith.constant 0 : index
      %c0_10 = arith.constant 0 : index
      %c0_11 = arith.constant 0 : index
      %15 = vector.load %arg3[%c0_9, %c0_10, %c0_11] : memref<1x64x128xf32, #tpu.memory_space<vmem>>, vector<1x64x128xf32>
      tpu.vector_store %arg3[%c0_9, %c0_10, %c0_11], %14 {strides = array<i32>} : memref<1x64x128xf32, #tpu.memory_space<vmem>>, vector<1x64x128xf32>,
    } else {
    }
    %c0 = arith.constant 0 : index
    %c0_1 = arith.constant 0 : index
    %3 = vector.load %arg2[%c0, %c0_1] : memref<64x128xbf16, #tpu.memory_space<vmem>>, vector<64x128xbf16>
    %4 = arith.extf %3 : vector<64x128xbf16> to vector<64x128xf32>
    %5 = arith.mulf %4, %4 : vector<64x128xf32>
    %c0_2 = arith.constant 0 : index
    %c0_3 = arith.constant 0 : index
    %c0_4 = arith.constant 0 : index
    %6 = vector.load %arg3[%c0_2, %c0_3, %c0_4] : memref<1x64x128xf32, #tpu.memory_space<vmem>>, vector<1x64x128xf32>
    %7 = vector.shape_cast %6 : vector<1x64x128xf32> to vector<64x128xf32>
    %8 = vector.shape_cast %5 : vector<64x128xf32> to vector<1x64x128xf32>
    %cst = arith.constant dense<0.000000e+00> : vector<64x128xf32>
    %9 = vector.multi_reduction <add>, %8, %cst [0] : vector<1x64x128xf32> to vector<64x128xf32>
    %10 = arith.addf %7, %9 : vector<64x128xf32>
    %c0_5 = arith.constant 0 : index
    %c0_6 = arith.constant 0 : index
    %c0_7 = arith.constant 0 : index
    %11 = vector.load %arg3[%c0_5, %c0_6, %c0_7] : memref<1x64x128xf32, #tpu.memory_space<vmem>>, vector<1x64x128xf32>
    %12 = vector.shape_cast %11 : vector<1x64x128xf32> to vector<64x128xf32>
    %13 = vector.shape_cast %10 : vector<64x128xf32> to vector<1x64x128xf32>
    tpu.vector_store %arg3[%c0_5, %c0_6, %c0_7], %13 {strides = array<i32>} : memref<1x64x128xf32, #tpu.memory_space<vmem>>, vector<1x64x128xf32>,
    return
  }
  func.func @transform_0(%arg0: i32, %arg1: i32) -> (i32, i32) {
    %c1_i32 = arith.constant 1 : i32
    %0 = arith.muli %arg0, %c1_i32 : i32
    %1 = arith.addi %0, %arg1 : i32
    %c0_i32 = arith.constant 0 : i32
    %c0_i32_0 = arith.constant 0 : i32
    return %1, %c0_i32 : i32, i32
  }
  func.func @transform_1(%arg0: i32, %arg1: i32) -> (i32, i32, i32) {
    %c0_i32 = arith.constant 0 : i32
    %c0_i32_0 = arith.constant 0 : i32
    %c0_i32_1 = arith.constant 0 : i32
    return %arg0, %c0_i32, %c0_i32_0 : i32, i32, i32
  }
}

</mosaic_0001>

<bundles_post_ra>
// kernel: _loss_impl.3
= control target key start
LH: loop header
LB: loop body
LE: loop exit
PB: predicated region body
PF: predicated region fallthrough
CT: control target
= control target key end

     0   :  { %s63_s0 = inlined_call_operand.vmem [shape: f32[8,128], index: 0, kind: input, shape index: {}]   ;;  %s64_s1 = inlined_call_operand.vmem [shape: f32[1,8,128], index: 1, kind: output, shape index: {}]  }
   0x1   :  { %v30_v0 = vld [vmem:[%s63_s0] sm:$0xff] }
   0x2   :  { %v31_v1 = vmul.f32 %v30_v0, %v30_v0 }
   0x4   :  { %35 = vst [vmem:[%s64_s1] sm:$0xff] %v31_v1 }

// kernel: _loss_impl.4
= control target key start
LH: loop header
LB: loop body
LE: loop exit
PB: predicated region body
PF: predicated region fallthrough
CT: control target
= control target key end

     0   :  { %6 = vsyncpa [#allocation3], 0  ;;  %s616_s0 = inlined_call_operand.hbm [shape: f32[256,128], index: 0, kind: input, shape index: {}]   ;;  %s617_s1 = inlined_call_operand.vmem [shape: f32[2,64,128], index: 1, kind: output, shape index: {}]  }
   0x1   :  { %8 = vsyncpa [#allocation3 + $0x1], 0  ;;  %s474_s6 = smov 0   ;;  %s476_s7 = smov 0  }
   0x2   :  { %s478_s8 = smov 0   ;;  %s480_s9 = smov 0  }
   0x3   :  { %s482_s10 = smov 0   ;;  %s484_s11 = smov 0  }
   0x4 LB: > { %s306_s12 = sadd.s32 4294967295, %s459_s11   ;;  %s26_s13 = sadd.s32 1, %s455_s10  ;;  %s459_s11 = sphi %s484_s11, %s14_s11   ;;  %s455_s10 = sphi %s482_s10, %s625_s10   ;;  %s451_s9 = sphi %s480_s9, %s624_s9   ;;  %s447_s8 = sphi %s478_s8, %s623_s8   ;;  %s443_s7 = sphi %s476_s7, %s622_s7   ;;  %s439_s6 = sphi %s474_s6, %s621_s6  }
   0x5   : > { %p28_p0 = scmp.ge.s32.totalorder %s26_s13, 2  ;;  %s35_s14 = sadd.s32 1, %s447_s8 }
   0x6   : > { %p42_p1 = scmp.ne.s32.totalorder %s447_s8, %s443_s7  ;;  %p43_p2 = scmp.eq.s32.totalorder %s459_s11, 0 }
   0x7   : > { %s627_s13 = smov (%p28_p0, %s26_s13), 0  ;;  %p48_p4 = scmp.ne.s32.totalorder %s443_s7, %s439_s6 }
   0x8   : > { %p510_p3 = por %p43_p2, %p42_p1  ;;  %s32_s16 = ssub.s32 %s455_s10, %s627_s13 }
   0x9   : > { %p49_p5 = scmp.eq.s32.totalorder %s306_s12, 0  ;;  %p33_p6 = scmp.eq.s32.totalorder %s32_s16, 0 }
   0xa   : > { %p327_p8 = scmp.lt.s32.totalorder %s459_s11, 2  ;;  %s98_s19 = sand.u32 1, %s447_s8  }
   0xb   : > { %p517_p7 = por %p49_p5, %p48_p4  ;;  %s319_s20 = sshll.u32 %s455_s10, 11 }
   0xc   : > { %s523_s18 = scalar_select %p33_p6, %s447_s8, %s35_s14  }
   0xd   : > { %s310_s21 = sshll.u32 %s98_s19, 7  ;;  %s530_s24 = scalar_lea.hbm %s616_s0, %s319_s20 }
   0xe   : > { %s102_s25 = scalar_lea.vmem [#allocation2], %s310_s21  ;;  %p534_p9 = pnand %p327_p8, %p510_p3 }
   0xf   : > { %s110_s26 = sshll.u32 %s102_s25, 4  ;;  %s540_s28 = scalar_lea.sflag [#allocation3], %s98_s19  ;;  %s538_s26 = int_to_ptr.vmem [resolvable:$true] %s110_s26 }
  0x10   : > { %s379_s29 = scalar_lea.hbm %s530_s24, 2048  ;;  %p381_p11 = pneg %p534_p9 }
  0x11   : > { %p380_p10 = scmp.ne.s32.totalorder %s530_s24, %s379_s29  ;;  %s384_s3 = scalar_lea.hbm %s616_s0, 4096 }
  0x12   : > { %p385_p0 = scmp.lt.u32.totalorder %s530_s24, %s616_s0  ;;  %p386_p1 = scmp.lt.u32.totalorder %s384_s3, %s379_s29 }
  0x13   : > { %p382_p12 = pnand %p381_p11, %p380_p10  ;;  %p388_p3 = scmp.lt.u32.totalorder %s379_s29, %s530_s24 }
  0x14   : > { %p387_p2 = por %p386_p1, %p385_p0 }
  0x15   : > { %p383_p13 = pneg %p382_p12 }
  0x16   : > { %p389_p4 = por %p388_p3, %p387_p2 }
  0x18   : > { %p390_p5 = pnand %p389_p4, %p383_p13 }
  0x1a   : > { %393 = shalt.err (!%p390_p5)
}
  0x1b   : > { %s394_s6 = scalar_lea.vmem %s538_s26, 2048  ;;  %s461_s12 = smov [#allocation2]  }
  0x1c   : > { %p395_p6 = scmp.ne.s32.totalorder %s538_s26, %s394_s6  ;;  %s399_s14 = sshll.u32 %s461_s12, 4  ;;  %s400_s14 = int_to_ptr.vmem [resolvable:$false] %s399_s14 }
  0x1d   : > { %s401_s15 = scalar_lea.vmem %s400_s14, 4096  ;;  %p402_p12 = scmp.lt.s32.totalorder %s538_s26, %s400_s14 }
  0x1e   : > { %p397_p8 = pnand %p395_p6, %p381_p11  ;;  %p403_p0 = scmp.lt.s32.totalorder %s401_s15, %s394_s6 }
  0x20   : > { %p398_p10 = pneg %p397_p8  ;;  %p404_p1 = por %p403_p0, %p402_p12 }
  0x22   : > { %p405_p2 = pnand %p404_p1, %p398_p10 }
  0x24   : > { %408 = shalt.err (!%p405_p2)
}
  0x25   : > { %s462_s16 = smov 128   ;;  %s463_s19 = smov 8  }
  0x26   : > { %326 = dma.hbm_to_vmem [thread:$0]  (!%p534_p9), %s530_s24, 2048, %s538_s26, %s540_s28, %s462_s16, %s462_s16, %s463_s19  }
  0x27   : > { %p313_p11 = scmp.ge.s32.totalorder %s459_s11, 1  ;;  %p118_p13 = scmp.lt.s32.totalorder %s459_s11, 3 }
  0x29   : > { %p119_p3 = pnand %p313_p11, %p118_p13 }
  0x2a   : > { %s124_s20 = sand.u32 (!%p119_p3), 1, %s443_s7  }
  0x2b   : > { %122 = sbr.rel (%p119_p3) target bundleno = 63 (0x3f), region = 24  ;;  %s314_s21 = sshll.u32 (!%p119_p3), %s124_s20, 7 }
  0x2c   : > { %s125_s22 = scalar_lea.sflag (!%p119_p3), [#allocation3], %s124_s20  ;;  %s571_s23 = scalar_lea.vmem (!%p119_p3), [#allocation2], %s314_s21 }
  0x32   : > { %434 = dma.done.wait (%p517_p7), %s125_s22, 2048  }
  0x33   : > { %436 = vsyncadd (%p517_p7), %s125_s22, 4294965248  ;;  %p149_p9 = scmp.lt.s32.totalorder %s451_s9, 1  ;;  %v166_v0 = vld [vmem:[%s571_s23] sm:$0xff]  ;;  %v167_v2 = vld [vmem:[%s571_s23 + $0x8] sm:$0xff] }
  0x34   : > { %v174_v1 = vld [vmem:[%s571_s23 + $0x40] sm:$0xff]  ;;  %v182_v3 = vmul.f32 %v166_v0, %v166_v0  ;;  %v175_v5 = vld [vmem:[%s571_s23 + $0x48] sm:$0xff]  ;;  %v183_v6 = vmul.f32 %v167_v2, %v167_v2  ;;  %v168_v7 = vld [vmem:[%s571_s23 + $0x10] sm:$0xff] }
  0x35   : > { %s629_s9 = smov (!%p149_p9, %s451_s9), 1  ;;  %v190_v4 = vmul.f32 %v174_v1, %v174_v1  ;;  %v176_v8 = vld [vmem:[%s571_s23 + $0x50] sm:$0xff]  ;;  %v191_v9 = vmul.f32 %v175_v5, %v175_v5  ;;  %v184_v10 = vmul.f32 %v168_v7, %v168_v7  ;;  %v169_v12 = vld [vmem:[%s571_s23 + $0x18] sm:$0xff]  ;;  %v170_v14 = vld [vmem:[%s571_s23 + $0x20] sm:$0xff] }
  0x36   : > { %s320_s24 = sshll.u32 %s629_s9, 6  ;;  %v192_v11 = vmul.f32 %v176_v8, %v176_v8  ;;  %v177_v13 = vld [vmem:[%s571_s23 + $0x58] sm:$0xff]  ;;  %v185_v16 = vmul.f32 %v169_v12, %v169_v12  ;;  %v178_v18 = vld [vmem:[%s571_s23 + $0x60] sm:$0xff]  ;;  %v186_v19 = vmul.f32 %v170_v14, %v170_v14  ;;  %v171_v20 = vld [vmem:[%s571_s23 + $0x28] sm:$0xff] }
  0x37   : > { %v206_v15 = vadd.f32 %v190_v4, %v182_v3  ;;  %v193_v17 = vmul.f32 %v177_v13, %v177_v13  ;;  %v179_v21 = vld [vmem:[%s571_s23 + $0x68] sm:$0xff]  ;;  %s153_s25 = scalar_lea.vmem %s617_s1, %s320_s24  ;;  %v207_v22 = vadd.f32 %v191_v9, %v183_v6  ;;  %v194_v24 = vmul.f32 %v178_v18, %v178_v18  ;;  %v172_v26 = vld [vmem:[%s571_s23 + $0x30] sm:$0xff]  ;;  %v173_v28 = vld [vmem:[%s571_s23 + $0x38] sm:$0xff] }
  0x38   : > { %v208_v23 = vadd.f32 %v192_v11, %v184_v10  ;;  %v187_v25 = vmul.f32 %v171_v20, %v171_v20  ;;  %v180_v27 = vld [vmem:[%s571_s23 + $0x70] sm:$0xff]  ;;  %v195_v30 = vmul.f32 %v179_v21, %v179_v21  ;;  %v188_v31 = vmul.f32 %v172_v26, %v172_v26  ;;  %v181_v32 = vld [vmem:[%s571_s23 + $0x78] sm:$0xff] }
  0x39   : > { %v209_v29 = vadd.f32 %v193_v17, %v185_v16  ;;  %v210_v33 = vadd.f32 %v194_v24, %v186_v19  ;;  %v196_v34 = vmul.f32 %v180_v27, %v180_v27  ;;  %222 = vst [vmem:[%s153_s25] sm:$0xff] %v206_v15  ;;  %v189_v36 = vmul.f32 %v173_v28, %v173_v28 }
  0x3a   : > { %v211_v35 = vadd.f32 %v195_v30, %v187_v25  ;;  %v197_v37 = vmul.f32 %v181_v32, %v181_v32  ;;  %223 = vst [vmem:[%s153_s25 + $0x8] sm:$0xff] %v207_v22  ;;  %224 = vst [vmem:[%s153_s25 + $0x10] sm:$0xff] %v208_v23 }
  0x3b   : > { %v212_v38 = vadd.f32 %v196_v34, %v188_v31  ;;  %225 = vst [vmem:[%s153_s25 + $0x18] sm:$0xff] %v209_v29  ;;  %226 = vst [vmem:[%s153_s25 + $0x20] sm:$0xff] %v210_v33 }
  0x3c   : > { %v213_v39 = vadd.f32 %v197_v37, %v189_v36  ;;  %227 = vst [vmem:[%s153_s25 + $0x28] sm:$0xff] %v211_v35 }
  0x3d   : > { %228 = vst [vmem:[%s153_s25 + $0x30] sm:$0xff] %v212_v38 }
  0x3e   : > { %229 = vst [vmem:[%s153_s25 + $0x38] sm:$0xff] %v213_v39 }
  0x3f PF: > { %s14_s11 = sadd.s32 1, %s459_s11   ;;  %s621_s6 = smov %s443_s7 }
  0x40   : > { %p11_p7 = scmp.ge.s32.totalorder %s14_s11, 4   ;;  %s622_s7 = smov %s447_s8 }
  0x41   : > { %s623_s8 = smov %s523_s18  ;;  %s624_s9 = smov %s455_s10 }
  0x42   : > { %s625_s10 = smov %s627_s13  ;;  %13 = sbr.rel (!%p11_p7) target bundleno = 4 (0x4), region = 68 }
  0x49   :  { %251 = vsyncpa [#allocation3], 1 }
  0x4a   :  { %253 = vsyncpa [#allocation3 + $0x1], 1 }

// kernel: _loss_impl.5
= control target key start
LH: loop header
LB: loop body
LE: loop exit
PB: predicated region body
PF: predicated region fallthrough
CT: control target
= control target key end

     0   :  { %s174_s0 = inlined_call_operand.vmem [shape: bf16[64,128], index: 0, kind: input, shape index: {}]   ;;  %s175_s1 = inlined_call_operand.vmem [shape: f32[1,64,128], index: 1, kind: output, shape index: {}]  }
   0x1   :  { %v109_v0 = vld [vmem:[%s174_s0] sm:$0xff]   ;;  %v124_v1 = vld [vmem:[%s174_s0 + $0x8] sm:$0xff]   ;;  %v125_v2 = vld [vmem:[%s174_s0 + $0x10] sm:$0xff]  }
   0x2   :  { %v110_v3 = vunpack.c.l.bf16 %v109_v0  ;;  %v111_v4 = vunpack.c.h.bf16 %v109_v0  ;;  %v114_v5 = vunpack.c.l.bf16 %v124_v1  ;;  %v115_v6 = vunpack.c.h.bf16 %v124_v1  ;;  %v126_v7 = vld [vmem:[%s174_s0 + $0x18] sm:$0xff]  }
   0x3   :  { %v118_v8 = vunpack.c.l.bf16 %v125_v2  ;;  %v119_v9 = vunpack.c.h.bf16 %v125_v2  ;;  %v122_v10 = vunpack.c.l.bf16 %v126_v7  ;;  %v123_v11 = vunpack.c.h.bf16 %v126_v7 }
   0x4   :  { %v58_v12 = vmul.f32 %v110_v3, %v110_v3  ;;  %v59_v13 = vmul.f32 %v111_v4, %v111_v4  ;;  %v60_v14 = vmul.f32 %v114_v5, %v114_v5  ;;  %v61_v15 = vmul.f32 %v115_v6, %v115_v6 }
   0x5   :  { %v62_v16 = vmul.f32 %v118_v8, %v118_v8  ;;  %v63_v17 = vmul.f32 %v119_v9, %v119_v9  ;;  %v64_v18 = vmul.f32 %v122_v10, %v122_v10  ;;  %v65_v19 = vmul.f32 %v123_v11, %v123_v11 }
   0x6   :  { %90 = vst [vmem:[%s175_s1] sm:$0xff] %v58_v12  ;;  %91 = vst [vmem:[%s175_s1 + $0x8] sm:$0xff] %v59_v13 }
   0x7   :  { %92 = vst [vmem:[%s175_s1 + $0x10] sm:$0xff] %v60_v14  ;;  %93 = vst [vmem:[%s175_s1 + $0x18] sm:$0xff] %v61_v15 }
   0x8   :  { %94 = vst [vmem:[%s175_s1 + $0x20] sm:$0xff] %v62_v16  ;;  %95 = vst [vmem:[%s175_s1 + $0x28] sm:$0xff] %v63_v17 }
   0x9   :  { %96 = vst [vmem:[%s175_s1 + $0x30] sm:$0xff] %v64_v18  ;;  %97 = vst [vmem:[%s175_s1 + $0x38] sm:$0xff] %v65_v19 }

</bundles_post_ra>
